<compile_context>
chip_gen: v5e
topology: v5e:2x2
jax: 0.10.0
libtpu: 0.0.40
codegen_flags: <defaults>
</compile_context>

<pallas_src>
import jax
import jax.numpy as jnp
import numpy as np
from jax.experimental import pallas as pl
from jax.experimental.pallas import tpu as pltpu


def _round_up(x, m):
    return ((x + m - 1) // m) * m


def _hw_params():
    """(query-tile target, vmem_limit_bytes) derived from the local TPU generation."""
    vmem_cap = 64 * 1024 * 1024  # conservative fallback (v7x per-TC VMEM)
    try:
        cap = getattr(pltpu.get_tpu_info(), "vmem_capacity_bytes", None)
        if cap:
            vmem_cap = int(cap)
    except Exception:
        pass
    if vmem_cap <= 96 * 1024 * 1024:
        # v7x-class: 64 MiB per TensorCore -> smaller tiles, leave headroom.
        return 128, (vmem_cap * 7) // 8
    # v5e / v6e: 128 MiB physical -> bigger tiles, ~112 MiB scoped limit.
    return 256, min((vmem_cap * 7) // 8, 112 * 1024 * 1024)


def _pick_q_tiling(seq_len, target):
    """Query tiling that never falls back to tq == S: keep ~ceil(S/target) tiles,
    round the tile to a multiple of 8, pad S up to n_q * tq (minimal padding)."""
    n_q = max(1, -(-seq_len // target))            # cdiv(seq_len, target)
    tq = _round_up(-(-seq_len // n_q), 8)          # ceil(seq_len / n_q) -> multiple of 8
    return tq, n_q, n_q * tq


def _make_attention_kernel(num_heads, head_dim, scale, q_tile, n_q,
                           seq_orig, seq_pad, compute_dtype):
    def kernel(x_ref, wq_ref, bq_ref, wo_ref, bo_ref, o_ref, p_ref):
        # ---- fused shared projection: Q == K == V == x @ WqT + bq (module quirk) ----
        p32 = jnp.dot(x_ref[...], wq_ref[...], preferred_element_type=jnp.float32)
        p_ref[...] = (p32 + bq_ref[...]).astype(compute_dtype)        # (S_pad, D)

        # ---- head-major K/V relayout: built ONCE per batch element (hoisted) ----
        kvh = jnp.transpose(
            p_ref[...].reshape(seq_pad, num_heads, head_dim), (1, 0, 2))  # (H, S_pad, Hd)

        wo = wo_ref[...]
        bo = bo_ref[...]

        # Mask for padded key columns (static no-op when no padding was added).
        if seq_pad != seq_orig:
            key_ids = jax.lax.broadcasted_iota(jnp.int32, (1, 1, seq_pad), 2)
            key_mask = jnp.where(key_ids < seq_orig, 0.0, -1e30).astype(jnp.float32)
        else:
            key_mask = None

        def q_step(qi, carry):
            q_start = pl.multiple_of(qi * q_tile, q_tile)
            q = p_ref[pl.ds(q_start, q_tile), :]                       # (tq, D)
            # Small per-tile relayout only (the full-sequence one is hoisted above).
            qh = jnp.transpose(q.reshape(q_tile, num_heads, head_dim), (1, 0, 2))

            # Heads-batched scores: contract head_dim directly (no explicit K^T), f32 acc.
            s = jnp.einsum("hqd,hkd->hqk", qh, kvh,
                           preferred_element_type=jnp.float32)         # (H, tq, S_pad)
            s = s * scale                                              # fp32 scale (matches torch)
            if key_mask is not None:
                s = s + key_mask

            # Numerically stable softmax over keys, kept in fp32.
            s = s - jnp.max(s, axis=-1, keepdims=True)
            e = jnp.exp(s)
            inv = pl.reciprocal(jnp.sum(e, axis=-1, keepdims=True), approx=True)
            prob = (e * inv).astype(compute_dtype)

            ctx = jnp.einsum("hqk,hkd->hqd", prob, kvh,
                             preferred_element_type=jnp.float32)       # (H, tq, Hd)
            ctx = ctx.astype(compute_dtype)                            # cast BEFORE relayout
            ctx = jnp.transpose(ctx, (1, 0, 2)).reshape(q_tile, num_heads * head_dim)

            out = jnp.dot(ctx, wo, preferred_element_type=jnp.float32) + bo
            o_ref[pl.ds(q_start, q_tile), :] = out.astype(o_ref.dtype)  # lane-dense store
            return carry

        jax.lax.fori_loop(0, n_q, q_step, 0, unroll=(n_q <= 8))

    return kernel


def vision_attention(x, wq_t, bq, wo_t, bo, num_heads, *,
                     compute_dtype=jnp.bfloat16, q_tile=None):
    """x: (B, S, D); wq_t / wo_t: (D, D) stored as (in, out); bq / bo: (1, D)."""
    B, S, D = x.shape
    assert D % num_heads == 0, "vector_dimension must be divisible by attention_heads"
    head_dim = D // num_heads
    scale = float(D) ** -0.5                 # module quirk: vector_dim**-0.5

    q_target, vmem_limit = _hw_params()
    if q_tile is not None:
        tq = _round_up(int(q_tile), 8)
    else:
        tq, _, _ = _pick_q_tiling(S, q_target)
    n_q = -(-S // tq)
    S_pad = n_q * tq

    # Cast matmul operands once host-side (halves HBM/VMEM traffic for bf16);
    # biases stay fp32 and are added post-accumulation.
    x_c = x.astype(compute_dtype)
    wq_c = wq_t.astype(compute_dtype)
    wo_c = wo_t.astype(compute_dtype)
    bq_f = bq.astype(jnp.float32)
    bo_f = bo.astype(jnp.float32)

    if S_pad != S:
        x_c = jnp.pad(x_c, ((0, 0), (0, S_pad - S), (0, 0)))

    kernel = _make_attention_kernel(num_heads, head_dim, scale, tq, n_q,
                                    S, S_pad, compute_dtype)

    out_padded = pl.pallas_call(
        kernel,
        out_shape=jax.ShapeDtypeStruct((B, S_pad, D), x.dtype),
        grid_spec=pltpu.PrefetchScalarGridSpec(
            num_scalar_prefetch=0,
            grid=(B,),
            in_specs=[
                pl.BlockSpec((None, S_pad, D), lambda b: (b, 0, 0)),   # x (per batch element)
                pl.BlockSpec((D, D), lambda b: (0, 0)),                # WqT (grid-invariant)
                pl.BlockSpec((1, D), lambda b: (0, 0)),                # bq
                pl.BlockSpec((D, D), lambda b: (0, 0)),                # WoT (grid-invariant)
                pl.BlockSpec((1, D), lambda b: (0, 0)),                # bo
            ],
            out_specs=pl.BlockSpec((None, S_pad, D), lambda b: (b, 0, 0)),
            scratch_shapes=[pltpu.VMEM((S_pad, D), compute_dtype)],    # projected Q=K=V
        ),
        compiler_params=pltpu.CompilerParams(
            # Batch axis "parallel": on v7x the 2 TensorCores split whole batch
            # elements, so weights / KV blocks / relayouts are never duplicated
            # for the same batch element.  No-op on single-TC v5e/v6e.
            dimension_semantics=("parallel",),
            vmem_limit_bytes=int(vmem_limit),
        ),
    )(x_c, wq_c, bq_f, wo_c, bo_f)

    return out_padded if S_pad == S else out_padded[:, :S, :]


def vision_attention_reference(x, wq_t, bq, wo_t, bo, num_heads):
    """Pure-JAX reference matching the (intended) PyTorch forward."""
    B, S, D = x.shape
    Hd = D // num_heads
    qkv = x @ wq_t + bq                                         # Q == K == V (module quirk)
    q = qkv.reshape(B, S, num_heads, Hd).transpose(0, 2, 1, 3)  # (B, H, S, Hd)
    scores = jnp.einsum("bhqd,bhkd->bhqk", q, q) * (float(D) ** -0.5)
    p = jax.nn.softmax(scores, axis=-1)
    ctx = jnp.einsum("bhqk,bhkd->bhqd", p, q)
    ctx = ctx.transpose(0, 2, 1, 3).reshape(B, S, D)
    return ctx @ wo_t + bo


if __name__ == "__main__":
    # Small configs consistent with the module (D divisible by num_heads).
    # NOTE: toy shapes (D=32 < 128 lanes) are for correctness only -- production
    # shapes keep D a multiple of 128 for lane-dense tiles.
    def run_case(B, S, D, H):
        key = jax.random.PRNGKey(0)
        kx, kwq, kbq, kwo, kbo = jax.random.split(key, 5)
        x = jax.random.normal(kx, (B, S, D), dtype=jnp.float32)
        # nn.Linear weights are (out, in); store transposed (in, out) for the kernel.
        wq_t = (jax.random.normal(kwq, (D, D), dtype=jnp.float32) / np.sqrt(D)).T
        bq = jax.random.normal(kbq, (1, D), dtype=jnp.float32) * 0.01
        wo_t = (jax.random.normal(kwo, (D, D), dtype=jnp.float32) / np.sqrt(D)).T
        bo = jax.random.normal(kbo, (1, D), dtype=jnp.float32) * 0.01

        ref = vision_attention_reference(x, wq_t, bq, wo_t, bo, num_heads=H)

        # fp32 path (tight tolerance; only the EUP approx reciprocal differs).
        out_f32 = jax.block_until_ready(
            vision_attention(x, wq_t, bq, wo_t, bo, num_heads=H,
                             compute_dtype=jnp.float32))
        np.testing.assert_allclose(np.asarray(out_f32), np.asarray(ref),
                                   rtol=5e-3, atol=5e-3)

        # bf16 MXU path (default): fp32 accumulation + fp32 softmax, looser tolerance.
        out_bf16 = jax.block_until_ready(
            vision_attention(x, wq_t, bq, wo_t, bo, num_heads=H))
        np.testing.assert_allclose(np.asarray(out_bf16), np.asarray(ref),
                                   rtol=1e-1, atol=1e-1)

    run_case(2, 8, 32, 4)    # exact-fit shape (no padding path)
    run_case(2, 13, 32, 4)   # non-divisible seq -> exercises padding + key masking

    print("KERNEL_OK")
</pallas_src>

<mosaic_0001>
module attributes {stable_mosaic.version = 11 : i64} {
  func.func @kernel(%arg0: i32, %arg1: memref<1x8x32xf32, #tpu.memory_space<vmem>>, %arg2: memref<32x32xf32, #tpu.memory_space<vmem>>, %arg3: memref<1x32xf32, #tpu.memory_space<vmem>>, %arg4: memref<32x32xf32, #tpu.memory_space<vmem>>, %arg5: memref<1x32xf32, #tpu.memory_space<vmem>>, %arg6: memref<1x8x32xf32, #tpu.memory_space<vmem>>, %arg7: memref<8x32xf32, #tpu.memory_space<vmem>>) attributes {dimension_semantics = [#tpu.dimension_semantics<parallel>], iteration_bounds = array<i64: 2>, scalar_prefetch = 0 : i64, scratch_operands = 1 : i64, tpu.core_type = #tpu.core_type<tc>, window_params = [{transform_indices = @transform_0, window_bounds = array<i64: 1, 8, 32>}, {pipeline_mode = #tpu.pipeline_mode<synchronous>, transform_indices = @transform_1, window_bounds = array<i64: 32, 32>}, {pipeline_mode = #tpu.pipeline_mode<synchronous>, transform_indices = @transform_2, window_bounds = array<i64: 1, 32>}, {pipeline_mode = #tpu.pipeline_mode<synchronous>, transform_indices = @transform_3, window_bounds = array<i64: 32, 32>}, {pipeline_mode = #tpu.pipeline_mode<synchronous>, transform_indices = @transform_4, window_bounds = array<i64: 1, 32>}, {transform_indices = @transform_5, window_bounds = array<i64: 1, 8, 32>}]} {
    %c0 = arith.constant 0 : index
    %c0_0 = arith.constant 0 : index
    %c0_1 = arith.constant 0 : index
    %0 = vector.load %arg1[%c0, %c0_0, %c0_1] : memref<1x8x32xf32, #tpu.memory_space<vmem>>, vector<1x8x32xf32>
    %1 = vector.shape_cast %0 : vector<1x8x32xf32> to vector<8x32xf32>
    %c0_2 = arith.constant 0 : index
    %c0_3 = arith.constant 0 : index
    %2 = vector.load %arg2[%c0_2, %c0_3] : memref<32x32xf32, #tpu.memory_space<vmem>>, vector<32x32xf32>
    %cst = arith.constant dense<0.000000e+00> : vector<8x32xf32>
    %3 = tpu.matmul %1, %2, %cst {dimension_numbers = #tpu.dot_dimension_numbers<[1], [0], [0], [1], [0, 0, 1, 1], [], []>} : vector<8x32xf32>, vector<32x32xf32>, vector<8x32xf32> -> vector<8x32xf32>
    %c0_4 = arith.constant 0 : index
    %c0_5 = arith.constant 0 : index
    %4 = vector.load %arg3[%c0_4, %c0_5] : memref<1x32xf32, #tpu.memory_space<vmem>>, vector<1x32xf32>
    %5 = vector.broadcast %4 : vector<1x32xf32> to vector<8x32xf32>
    %6 = arith.addf %3, %5 : vector<8x32xf32>
    %c0_6 = arith.constant 0 : index
    %c0_7 = arith.constant 0 : index
    %7 = vector.load %arg7[%c0_6, %c0_7] : memref<8x32xf32, #tpu.memory_space<vmem>>, vector<8x32xf32>
    tpu.vector_store %arg7[%c0_6, %c0_7], %6 {strides = array<i32>} : memref<8x32xf32, #tpu.memory_space<vmem>>, vector<8x32xf32>,
    %c0_8 = arith.constant 0 : index
    %c0_9 = arith.constant 0 : index
    %8 = vector.load %arg7[%c0_8, %c0_9] : memref<8x32xf32, #tpu.memory_space<vmem>>, vector<8x32xf32>
    %9 = vector.shape_cast %8 : vector<8x32xf32> to vector<8x4x8xf32>
    %10 = tpu.transpose %9, [1, 0, 2] : vector<8x4x8xf32> -> vector<4x8x8xf32>
    %c0_10 = arith.constant 0 : index
    %c0_11 = arith.constant 0 : index
    %11 = vector.load %arg4[%c0_10, %c0_11] : memref<32x32xf32, #tpu.memory_space<vmem>>, vector<32x32xf32>
    %c0_12 = arith.constant 0 : index
    %c0_13 = arith.constant 0 : index
    %12 = vector.load %arg5[%c0_12, %c0_13] : memref<1x32xf32, #tpu.memory_space<vmem>>, vector<1x32xf32>
    %c0_i32 = arith.constant 0 : i32
    %c8_i32 = arith.constant 8 : i32
    %13 = arith.muli %c0_i32, %c8_i32 : i32
    %14 = tpu.assume_multiple %13, 8 : i32
    %15 = arith.index_cast %14 : i32 to index
    %c0_14 = arith.constant 0 : index
    %16 = vector.load %arg7[%15, %c0_14] : memref<8x32xf32, #tpu.memory_space<vmem>>, vector<8x32xf32>
    %17 = vector.shape_cast %16 : vector<8x32xf32> to vector<8x4x8xf32>
    %18 = tpu.transpose %17, [1, 0, 2] : vector<8x4x8xf32> -> vector<4x8x8xf32>
    "tpu.trace_start"() <{level = 10 : i32, message = "hqd,hkd->hqk"}> : () -> ()
    %cst_15 = arith.constant dense<0.000000e+00> : vector<4x8x8xf32>
    %19 = tpu.matmul %18, %10, %cst_15 {dimension_numbers = #tpu.dot_dimension_numbers<[2], [2], [1], [1], [0, 0, 0, 1, 1, 1], [0], [0]>} : vector<4x8x8xf32>, vector<4x8x8xf32>, vector<4x8x8xf32> -> vector<4x8x8xf32>
    "tpu.trace_stop"() : () -> ()
    %cst_16 = arith.constant 0.176776692 : f32
    %20 = vector.broadcast %cst_16 : f32 to vector<4x8x8xf32>
    %21 = arith.mulf %19, %20 : vector<4x8x8xf32>
    %cst_17 = arith.constant dense<0xFF800000> : vector<4x8xf32>
    %22 = vector.multi_reduction <maximumf>, %21, %cst_17 [2] : vector<4x8x8xf32> to vector<4x8xf32>
    %23 = vector.shape_cast %22 : vector<4x8xf32> to vector<4x8x1xf32>
    %24 = vector.broadcast %23 : vector<4x8x1xf32> to vector<4x8x8xf32>
    %25 = arith.subf %21, %24 : vector<4x8x8xf32>
    %26 = math.exp %25 : vector<4x8x8xf32>
    %cst_18 = arith.constant dense<0.000000e+00> : vector<4x8xf32>
    %27 = vector.multi_reduction <add>, %26, %cst_18 [2] : vector<4x8x8xf32> to vector<4x8xf32>
    %28 = vector.shape_cast %27 : vector<4x8xf32> to vector<4x8x1xf32>
    %29 = tpu.reciprocal %28 {approx = true} : vector<4x8x1xf32> -> vector<4x8x1xf32>
    %30 = vector.broadcast %29 : vector<4x8x1xf32> to vector<4x8x8xf32>
    %31 = arith.mulf %26, %30 : vector<4x8x8xf32>
    "tpu.trace_start"() <{level = 10 : i32, message = "hqk,hkd->hqd"}> : () -> ()
    %cst_19 = arith.constant dense<0.000000e+00> : vector<4x8x8xf32>
    %32 = tpu.matmul %31, %10, %cst_19 {dimension_numbers = #tpu.dot_dimension_numbers<[2], [1], [1], [2], [0, 0, 0, 1, 1, 2], [0], [0]>} : vector<4x8x8xf32>, vector<4x8x8xf32>, vector<4x8x8xf32> -> vector<4x8x8xf32>
    "tpu.trace_stop"() : () -> ()
    %33 = tpu.transpose %32, [1, 0, 2] : vector<4x8x8xf32> -> vector<8x4x8xf32>
    %34 = vector.shape_cast %33 : vector<8x4x8xf32> to vector<8x32xf32>
    %cst_20 = arith.constant dense<0.000000e+00> : vector<8x32xf32>
    %35 = tpu.matmul %34, %11, %cst_20 {dimension_numbers = #tpu.dot_dimension_numbers<[1], [0], [0], [1], [0, 0, 1, 1], [], []>} : vector<8x32xf32>, vector<32x32xf32>, vector<8x32xf32> -> vector<8x32xf32>
    %36 = vector.broadcast %12 : vector<1x32xf32> to vector<8x32xf32>
    %37 = arith.addf %35, %36 : vector<8x32xf32>
    %c0_21 = arith.constant 0 : index
    %38 = arith.index_cast %14 : i32 to index
    %c0_22 = arith.constant 0 : index
    %39 = vector.load %arg6[%c0_21, %38, %c0_22] : memref<1x8x32xf32, #tpu.memory_space<vmem>>, vector<1x8x32xf32>
    %40 = vector.shape_cast %39 : vector<1x8x32xf32> to vector<8x32xf32>
    %41 = vector.shape_cast %37 : vector<8x32xf32> to vector<1x8x32xf32>
    tpu.vector_store %arg6[%c0_21, %38, %c0_22], %41 {strides = array<i32>} : memref<1x8x32xf32, #tpu.memory_space<vmem>>, vector<1x8x32xf32>,
    %c1_i32 = arith.constant 1 : i32
    return
  }
  func.func @transform_0(%arg0: i32) -> (i32, i32, i32) {
    %c0_i32 = arith.constant 0 : i32
    %c0_i32_0 = arith.constant 0 : i32
    %c0_i32_1 = arith.constant 0 : i32
    return %arg0, %c0_i32, %c0_i32_0 : i32, i32, i32
  }
  func.func @transform_1(%arg0: i32) -> (i32, i32) {
    %c0_i32 = arith.constant 0 : i32
    %c0_i32_0 = arith.constant 0 : i32
    %c0_i32_1 = arith.constant 0 : i32
    return %c0_i32, %c0_i32_0 : i32, i32
  }
  func.func @transform_2(%arg0: i32) -> (i32, i32) {
    %c0_i32 = arith.constant 0 : i32
    %c0_i32_0 = arith.constant 0 : i32
    %c0_i32_1 = arith.constant 0 : i32
    return %c0_i32, %c0_i32_0 : i32, i32
  }
  func.func @transform_3(%arg0: i32) -> (i32, i32) {
    %c0_i32 = arith.constant 0 : i32
    %c0_i32_0 = arith.constant 0 : i32
    %c0_i32_1 = arith.constant 0 : i32
    return %c0_i32, %c0_i32_0 : i32, i32
  }
  func.func @transform_4(%arg0: i32) -> (i32, i32) {
    %c0_i32 = arith.constant 0 : i32
    %c0_i32_0 = arith.constant 0 : i32
    %c0_i32_1 = arith.constant 0 : i32
    return %c0_i32, %c0_i32_0 : i32, i32
  }
  func.func @transform_5(%arg0: i32) -> (i32, i32, i32) {
    %c0_i32 = arith.constant 0 : i32
    %c0_i32_0 = arith.constant 0 : i32
    %c0_i32_1 = arith.constant 0 : i32
    return %arg0, %c0_i32, %c0_i32_0 : i32, i32, i32
  }
}

</mosaic_0001>

<bundles_post_ra>
// kernel: tpu_custom_call.1
= control target key start
LH: loop header
LB: loop body
LE: loop exit
PB: predicated region body
PF: predicated region fallthrough
CT: control target
= control target key end

     0   :  { %10 = vsyncpa [#allocation4], 0  ;;  %s1694_s0 = inlined_call_operand.hbm [shape: f32[2,8,32], index: 0, kind: input, shape index: {}]   ;;  %s1695_s1 = inlined_call_operand.hbm [shape: f32[32,32], index: 1, kind: input, shape index: {}]   ;;  %s1696_s2 = inlined_call_operand.vmem [shape: f32[1,32], index: 2, kind: input, shape index: {}]   ;;  %s1697_s3 = inlined_call_operand.hbm [shape: f32[32,32], index: 3, kind: input, shape index: {}]   ;;  %s1698_s4 = inlined_call_operand.vmem [shape: f32[1,32], index: 4, kind: input, shape index: {}]   ;;  %s1699_s5 = inlined_call_operand.hbm [shape: f32[2,8,32], index: 5, kind: output, shape index: {}]  }
   0x1   :  { %12 = vsyncpa [#allocation4 + $0x1], 0 }
   0x2   :  { %13 = vsyncpa [#allocation7], 0 }
   0x3   :  { %14 = vsyncpa [#allocation5], 0 }
   0x4   :  { %16 = vsyncpa [#allocation5 + $0x1], 0  ;;  %s1390_s18 = smov 0   ;;  %s1392_s19 = smov 0  }
   0x5   :  { %s1394_s20 = smov 0   ;;  %s1396_s21 = smov 0  }
   0x6 LB: > { %s174_s24 = sshll.u32 %s1695_s1, 4  ;;  %s1414_s25 = sadd.s32 4294967295, %s1346_s21   ;;  %s1346_s21 = sphi %s1396_s21, %s1710_s21   ;;  %s1342_s20 = sphi %s1394_s20, %s1709_s20   ;;  %s1338_s19 = sphi %s1392_s19, %s1708_s19   ;;  %s1334_s18 = sphi %s1390_s18, %s1707_s18   ;;  %s175_s24 = int_to_ptr.hbm [resolvable:$true] %s174_s24 }
   0x7   : > { %p1062_p0 = scmp.ge.s32.totalorder %s1346_s21, 1  ;;  %p43_p1 = scmp.eq.s32.totalorder %s1414_s25, 0 }
   0x8   : > { %p163_p2 = scmp.lt.s32.totalorder %s1346_s21, 3  ;;  %s1348_s27 = smov [#allocation6]  }
   0x9   : > { %s176_s28 = sshll.u32 %s1348_s27, 4  ;;  %s191_s6 = sshll.u32 %s1697_s3, 4  ;;  %s177_s28 = int_to_ptr.vmem [resolvable:$true] %s176_s28  ;;  %s192_s6 = int_to_ptr.hbm [resolvable:$true] %s191_s6 }
   0xa   : > { %p1419_p3 = pnand %p1062_p0, %p163_p2  ;;  %s1349_s7 = smov [#allocation8]  }
   0xb   : > { %s193_s8 = sshll.u32 %s1349_s7, 4  ;;  %s1350_s9 = smov 128   ;;  %s194_s8 = int_to_ptr.vmem [resolvable:$true] %s193_s8 }
   0xc   : > { %p1103_p4 = pneg %p1419_p3  ;;  %s1351_s10 = smov 8  }
   0xd   : > { %s1061_s11 = sadd.s32 4294967294, %s1346_s21   ;;  %s1433_s12 = sadd.s32 1, %s1346_s21  }
   0xe   : > { %p1104_p6 = pnand %p1103_p4, %p43_p1  ;;  %s26_s13 = ssub.s32 %s1346_s21, %s1433_s12 }
   0xf   : > { %s29_s14 = sadd.s32 1, %s1342_s20  ;;  %p27_p7 = scmp.eq.s32.totalorder %s26_s13, 0 }
  0x10   : > { %1106 = dma.hbm_to_vmem [thread:$0]  (!%p1104_p6), %s175_s24, 512, %s177_s28, [#allocation7], %s1350_s9, %s1350_s9, %s1351_s10  }
  0x11   : > { %1109 = dma.hbm_to_vmem [thread:$0]  (!%p1104_p6), %s192_s6, 512, %s194_s8, [#allocation7], %s1350_s9, %s1350_s9, %s1351_s10  }
  0x12   : > { %p36_p8 = scmp.ne.s32.totalorder %s1342_s20, %s1338_s19  ;;  %p37_p9 = scmp.eq.s32.totalorder %s1346_s21, 0 }
  0x13   : > { %p42_p10 = scmp.ne.s32.totalorder %s1338_s19, %s1334_s18  ;;  %p150_p13 = scmp.eq.s32.totalorder %s1414_s25, 1 }
  0x14   : > { %s1444_s15 = scalar_select %p27_p7, %s1342_s20, %s29_s14  }
  0x15   : > { %p1446_p11 = por %p37_p9, %p36_p8  ;;  %p1452_p12 = por %p43_p1, %p42_p10 }
  0x16   : > { %p156_p0 = scmp.eq.s32.totalorder %s1061_s11, 1  ;;  %p1120_p2 = scmp.lt.s32.totalorder %s1346_s21, 2 }
  0x17   : > { %s210_s22 = sand.u32 1, %s1342_s20   ;;  %p1459_p4 = por %p150_p13, %p36_p8 }
  0x18   : > { %p1463_p6 = por %p156_p0, %p42_p10  ;;  %s1066_s27 = sshll.u32 %s210_s22, 3 }
  0x19   : > { %s1067_s28 = sshll.u32 %s1346_s21, 3  ;;  %s214_s7 = scalar_lea.vmem [#allocation3], %s1066_s27 }
  0x1a   : > { %s218_s6 = scalar_lea.hbm %s1694_s0, %s1067_s28  ;;  %s222_s8 = sshll.u32 %s214_s7, 4  ;;  %s223_s8 = int_to_ptr.vmem [resolvable:$true] %s222_s8 }
  0x1b   : > { %s220_s9 = sshll.u32 %s218_s6, 4  ;;  %p1473_p7 = pnand %p1120_p2, %p1446_p11  ;;  %s221_s9 = int_to_ptr.hbm [resolvable:$true] %s220_s9 }
  0x1c   : > { %s211_s11 = scalar_lea.sflag [#allocation4], %s210_s22  ;;  %s1246_s13 = sshra.s32 %s221_s9, 4  ;;  %s1247_s13 = int_to_ptr.hbm [resolvable:$true] %s1246_s13 }
  0x1d   : > { %s1248_s14 = scalar_lea.hbm %s1247_s13, 8  ;;  %p1250_p9 = pneg %p1473_p7 }
  0x1e   : > { %p1249_p8 = scmp.ne.s32.totalorder %s1247_s13, %s1248_s14  ;;  %s1253_s29 = scalar_lea.hbm %s1694_s0, 16 }
  0x1f   : > { %p1254_p11 = scmp.lt.s32.totalorder %s1247_s13, %s1694_s0  ;;  %p1255_p0 = scmp.lt.s32.totalorder %s1253_s29, %s1248_s14 }
  0x20   : > { %p1251_p10 = pnand %p1250_p9, %p1249_p8 }
  0x21   : > { %p1256_p2 = por %p1255_p0, %p1254_p11 }
  0x22   : > { %p1252_p13 = pneg %p1251_p10 }
  0x24   : > { %p1257_p5 = pnand %p1256_p2, %p1252_p13 }
  0x26   : > { %1260 = shalt.err (!%p1257_p5)
}
  0x27   : > { %1113 = dma.hbm_to_vmem [thread:$0]  (!%p1473_p7), %s221_s9, 128, %s223_s8, %s211_s11  }
  0x28   : > { %231 = sbr.rel (%p1419_p3) target bundleno = 1141 (0x475), region = 40  ;;  %s1490_s22 = sand.u32 (!%p1419_p3), 1, %s1338_s19  }
  0x29   : > { %s1069_s6 = sshll.u32 (!%p1419_p3), %s1490_s22, 3  ;;  %s234_s7 = scalar_lea.sflag (!%p1419_p3), [#allocation4], %s1490_s22 }
  0x2a   : > { %s237_s13 = scalar_lea.vmem (!%p1419_p3), [#allocation3], %s1069_s6 }
  0x2d   : > { %1321 = dma.done.wait (%p1452_p12), %s234_s7, 128  }
  0x2e   : > { %1323 = vsyncadd (%p1452_p12), %s234_s7, 4294967168 }
  0x2f   : > { %1325 = dma.done.wait (%p43_p1), [#allocation7], 1024  }
  0x30   : > { %1327 = vsyncadd (%p43_p1), [#allocation7], 4294966272  ;;  %v279_v0 = vld [vmem:[#allocation6 + $0x18] sm:$0xff]  ;;  %v278_v1 = vld [vmem:[#allocation6 + $0x10] sm:$0xff]  ;;  %vm284_vm0 = vcmask 261120   ;;  %s1352_s8 = smov 104  }
  0x31   : > { %300 = vmatpush.msra.mxu0 %v279_v0  ;;  %v277_v2 = vld [vmem:[#allocation6 + $0x8] sm:$0xff]  ;;  %v276_v3 = vld [vmem:[#allocation6] sm:$0xff]  ;;  %v275_v4 = vld [vmem:[%s237_s13] sm:$0xff]  ;;  %s1353_s9 = smov 112   ;;  %s1354_s10 = smov 120   ;;  %vm321_vm1 = vcmask 1047556  }
  0x32   : > { %v1168_v5 = vld [vmem:[%s1696_s2] ss:$0 sm:$0xff]  ;;  %v1355_v11 = vmov 1983009808   ;;  %v1356_v18 = vmov 1934713408  }
  0x33   : > { %301 = vmatpush.msra.mxu0 %v278_v1  ;;  %v326_v12 = vunpack.c.l.s4 %v1355_v11  ;;  %v350_v19 = vunpack.c.l.s4 %v1356_v18  ;;  %vm557_vm2 = vcmask 64512   ;;  %s1357_s11 = smov 24   ;;  %s1358_s14 = smov 16   ;;  %vm925_vm3 = vcmask 130048  }
  0x34   : > { %s1359_s27 = smov 8   ;;  %vm927_vm4 = vcmask 195584   ;;  %s1088_s28 = sshll.u32 %s1414_s25, 3 }
  0x35   : > { %302 = vmatpush.msra.mxu0 %v277_v2  ;;  %v1509_v15 = vunpack.c.0.s8 %v326_v12  ;;  %v1515_v24 = vunpack.c.0.s8 %v350_v19  ;;  %s967_s16 = scalar_lea.hbm %s1699_s5, %s1088_s28  ;;  %s274_s26 = scalar_lea.vmem [#allocation9], %s1069_s6 }
  0x36   : > { %s969_s17 = sshll.u32 %s274_s26, 4  ;;  %s957_s25 = scalar_lea.sflag [#allocation5], %s1490_s22  ;;  %s970_s17 = int_to_ptr.vmem [resolvable:$true] %s969_s17 }
  0x37   : > { %303 = vmatpush.msra.mxu0 %v276_v3  ;;  %s1296_s6 = scalar_lea.hbm %s1699_s5, 16 }
  0x38   : > { %1073 = vmatmul.msk.f32.vlgmr.msra.gmra.mxu0 %vm284_vm0, %v275_v4 }
  0xb5   : > { %v305_v6 = vpop.f32.mrf.mxu0 }
  0xb6   : > { %v306_v7 = vadd.f32 %v1168_v5, %v305_v6 }
  0xb8   : > { %308 = vst.msk [vmem:[#allocation2] sm:$0xff] %vm284_vm0, %v306_v7 }
  0xbf   : > { %v436_v8 = vld [vmem:[#allocation2] sm:$0xff] }
  0xc0   : > { %444 = vrot.lane.b32.xlu2 %v436_v8, %s1352_s8  ;;  %441 = vrot.lane.b32.xlu1 %v436_v8, %s1353_s9  ;;  %v449_v22 = vrot.slane %v436_v8, 4 }
  0xc1   : > { %314 = vrot.lane.b32.xlu0 %v436_v8, %s1353_s9 }
  0xc8   : > { %438 = vrot.lane.b32.xlu2 %v436_v8, %s1354_s10  ;;  %311 = vrot.lane.b32.xlu1 %v436_v8, %s1354_s10 }
  0xc9   : > { %317 = vrot.lane.b32.xlu0 %v436_v8, %s1352_s8  ;;  %s971_s8 = sshll.u32 %s967_s16, 4  ;;  %s972_s8 = int_to_ptr.hbm [resolvable:$true] %s971_s8 }
  0xca   : > { %s1290_s9 = sshra.s32 %s972_s8, 4  ;;  %s1291_s9 = int_to_ptr.hbm [resolvable:$true] %s1290_s9 }
  0xcb   : > { %s1292_s10 = scalar_lea.hbm %s1291_s9, 8  ;;  %p1297_p12 = scmp.lt.s32.totalorder %s1291_s9, %s1699_s5 }
  0xcc   : > { %p1293_p1 = scmp.ne.s32.totalorder %s1291_s9, %s1292_s10  ;;  %p1298_p7 = scmp.lt.s32.totalorder %s1296_s6, %s1292_s10 }
  0xce   : > { %p1294_p3 = pnand %p1293_p1, %p1459_p4  ;;  %p1299_p8 = por %p1298_p7, %p1297_p12 }
  0xd0   : > { %p1295_p5 = pneg %p1294_p3 }
  0xd2   : > { %p1300_p9 = pnand %p1299_p8, %p1295_p5 }
 0x11a   : > { %v445_v9 = vpop.permute.xlu2 %444 }
 0x11b   : > { %v459_v14 = vrot.slane %v445_v9, 4 }
 0x122   : > { %v439_v10 = vpop.permute.xlu2 %438 }
 0x123   : > { %v461_v13 = vrot.slane %v439_v10, 4  ;;  %v460_v17 = vsel %vm321_vm1, %v459_v14, %v439_v10 }
 0x124   : > { %v466_v21 = vperm.slane %v460_v17, %v1509_v15 }
 0x125   : > { %v462_v16 = vsel %vm321_vm1, %v445_v9, %v461_v13 }
 0x126   : > { %v470_v20 = vperm.slane %v462_v16, %v1509_v15  ;;  %v471_v31 = vrot.slane %v466_v21, 4 }
 0x128   : > { %v483_v28 = vrot.slane %v470_v20, 4 }
 0x132   : > { %v442_v23 = vpop.permute.xlu1 %441 }
 0x133   : > { %v447_v25 = vrot.slane %v442_v23, 4  ;;  %v450_v26 = vsel %vm321_vm1, %v442_v23, %v449_v22  ;;  %v315_v27 = vpop.permute.xlu0 %314 }
 0x134   : > { %v458_v29 = vperm.slane %v450_v26, %v1509_v15  ;;  %v320_v30 = vrot.slane %v315_v27, 4  ;;  %v324_v33 = vsel %vm321_vm1, %v315_v27, %v449_v22 }
 0x135   : > { %v448_v32 = vsel %vm321_vm1, %v447_v25, %v436_v8  ;;  %v332_v42 = vperm.slane %v324_v33, %v1509_v15 }
 0x136   : > { %v454_v34 = vperm.slane %v448_v32, %v1509_v15  ;;  %v484_v35 = vsel %vm321_vm1, %v483_v28, %v458_v29  ;;  %v485_v36 = vrot.slane %v458_v29, 4  ;;  %v322_v37 = vsel %vm321_vm1, %v320_v30, %v436_v8 }
 0x137   : > { %v490_v38 = vperm.slane %v484_v35, %v1515_v24  ;;  %v328_v45 = vperm.slane %v322_v37, %v1509_v15  ;;  %v359_v53 = vrot.slane %v332_v42, 4 }
 0x138   : > { %v472_v39 = vsel %vm321_vm1, %v471_v31, %v454_v34  ;;  %v473_v40 = vrot.slane %v454_v34, 4  ;;  %v486_v41 = vsel %vm321_vm1, %v470_v20, %v485_v36 }
 0x139   : > { %v478_v43 = vperm.slane %v472_v39, %v1515_v24  ;;  %v494_v44 = vperm.slane %v486_v41, %v1515_v24  ;;  %v499_v47 = vrot.slane %v490_v38, 4  ;;  %v347_v59 = vrot.slane %v328_v45, 4 }
 0x13a   : > { %v474_v46 = vsel %vm321_vm1, %v466_v21, %v473_v40  ;;  %v312_v48 = vpop.permute.xlu1 %311 }
 0x13b   : > { %v482_v49 = vperm.slane %v474_v46, %v1515_v24  ;;  %v495_v50 = vrot.slane %v478_v43, 4  ;;  %v501_v51 = vrot.slane %v494_v44, 4  ;;  %v318_v52 = vpop.permute.xlu0 %317  ;;  %v335_v54 = vrot.slane %v312_v48, 4 }
 0x13c   : > { %v333_v55 = vrot.slane %v318_v52, 4  ;;  %v500_v60 = vsel %vm321_vm1, 0.0, %v499_v47 }
 0x13d   : > { %v497_v56 = vrot.slane %v482_v49, 4  ;;  %v502_v57 = vsel %vm321_vm1, 0.0, %v501_v51  ;;  %v514_v58 = vsel %vm321_vm1, %v501_v51, %v490_v38  ;;  %v336_v63 = vsel %vm321_vm1, %v318_v52, %v335_v54 }
 0x13e   : > { %v519_v61 = vrot.slane %v502_v57, 4  ;;  %v334_v62 = vsel %vm321_vm1, %v333_v55, %v312_v48  ;;  %v344_v2 = vperm.slane %v336_v63, %v1509_v15  ;;  %v496_v3 = vsel %vm321_vm1, 0.0, %v495_v50 }
 0x13f   : > { %v498_v0 = vsel %vm321_vm1, 0.0, %v497_v56  ;;  %v340_v1 = vperm.slane %v334_v62, %v1509_v15  ;;  %v518_v4 = vperm.slane %v514_v58, %v1509_v15  ;;  %v503_v6 = vsel %vm321_vm1, %v497_v56, %v478_v43 }
 0x140   : > { %v520_v5 = vsel %vm321_vm1, %v519_v61, %v500_v60  ;;  %v508_v7 = vrot.slane %v498_v0, 4  ;;  %v357_v10 = vrot.slane %v344_v2, 4  ;;  %v360_v11 = vsel %vm321_vm1, %v344_v2, %v359_v53 }
 0x141   : > { %v345_v8 = vrot.slane %v340_v1, 4  ;;  %v348_v9 = vsel %vm321_vm1, %v340_v1, %v347_v59  ;;  %v368_v13 = vperm.slane %v360_v11, %v1515_v24  ;;  %v524_v16 = vperm.slane %v520_v5, %v1509_v15 }
 0x142   : > { %v356_v12 = vperm.slane %v348_v9, %v1515_v24  ;;  %v509_v14 = vsel %vm321_vm1, %v508_v7, %v496_v3  ;;  %v358_v18 = vsel %vm321_vm1, %v357_v10, %v332_v42  ;;  %v507_v19 = vperm.slane %v503_v6, %v1509_v15 }
 0x143   : > { %v346_v17 = vsel %vm321_vm1, %v345_v8, %v328_v45  ;;  %v513_v20 = vperm.slane %v509_v14, %v1509_v15  ;;  %v364_v22 = vperm.slane %v358_v18, %v1515_v24  ;;  %v375_v25 = vrot.slane %v368_v13, 4 }
 0x144   : > { %v352_v21 = vperm.slane %v346_v17, %v1515_v24  ;;  %v371_v23 = vrot.slane %v356_v12, 4  ;;  %v539_v26 = vrot.slane %v518_v4, 4  ;;  %v537_v27 = vrot.slane %v524_v16, 4 }
 0x145   : > { %v373_v29 = vrot.slane %v364_v22, 4  ;;  %v376_v30 = vsel %vm321_vm1, 0.0, %v375_v25  ;;  %v388_v31 = vsel %vm321_vm1, %v375_v25, %v364_v22  ;;  %v527_v38 = vrot.slane %v507_v19, 4 }
 0x146   : > { %v372_v28 = vsel %vm321_vm1, 0.0, %v371_v23  ;;  %v392_v33 = vperm.slane %v388_v31, %v1509_v15  ;;  %v393_v34 = vrot.slane %v376_v30, 4  ;;  %v369_v35 = vrot.slane %v352_v21, 4 }
 0x147   : > { %v382_v32 = vrot.slane %v372_v28, 4  ;;  %v374_v36 = vsel %vm321_vm1, 0.0, %v373_v29  ;;  %v377_v37 = vsel %vm321_vm1, %v371_v23, %v352_v21  ;;  %v525_v39 = vrot.slane %v513_v20, 4 }
 0x148   : > { %v370_v40 = vsel %vm321_vm1, 0.0, %v369_v35  ;;  %v381_v41 = vperm.slane %v377_v37, %v1509_v15  ;;  %v394_v42 = vsel %vm321_vm1, %v393_v34, %v374_v36  ;;  %v413_v43 = vrot.slane %v392_v33, 4 }
 0x149   : > { %v383_v44 = vsel %vm321_vm1, %v382_v32, %v370_v40  ;;  %v398_v45 = vperm.slane %v394_v42, %v1509_v15  ;;  %v540_v46 = vsel %vm321_vm1, %v524_v16, %v539_v26  ;;  %v538_v49 = vsel %vm321_vm1, %v537_v27, %v518_v4 }
 0x14a   : > { %v387_v47 = vperm.slane %v383_v44, %v1509_v15  ;;  %v401_v48 = vrot.slane %v381_v41, 4  ;;  %v528_v52 = vsel %vm321_vm1, %v513_v20, %v527_v38  ;;  %v526_v53 = vsel %vm321_vm1, %v525_v39, %v507_v19 }
 0x14b   : > { %v414_v50 = vsel %vm321_vm1, %v398_v45, %v413_v43  ;;  %v411_v51 = vrot.slane %v398_v45, 4  ;;  %v548_v57 = vperm.slane %v540_v46, %v1515_v24  ;;  %v544_v60 = vperm.slane %v538_v49, %v1515_v24 }
 0x14c   : > { %v402_v54 = vsel %vm321_vm1, %v387_v47, %v401_v48  ;;  %v422_v55 = vperm.slane %v414_v50, %v1515_v24  ;;  %v399_v56 = vrot.slane %v387_v47, 4  ;;  %v532_v0 = vperm.slane %v526_v53, %v1515_v24 }
 0x14d   : > { %v410_v58 = vperm.slane %v402_v54, %v1515_v24  ;;  %v412_v59 = vsel %vm321_vm1, %v411_v51, %v392_v33  ;;  %v536_v2 = vperm.slane %v528_v52, %v1515_v24  ;;  %v553_v5 = vrot.slane %v548_v57, 4 }
 0x14e   : > { %v427_v61 = vrot.slane %v422_v55, 4  ;;  %v400_v62 = vsel %vm321_vm1, %v399_v56, %v381_v41  ;;  %v418_v63 = vperm.slane %v412_v59, %v1515_v24  ;;  %v549_v8 = vrot.slane %v544_v60, 4 }
 0x14f   : > { %v406_v1 = vperm.slane %v400_v62, %v1515_v24  ;;  %v429_v6 = vrot.slane %v410_v58, 4  ;;  %v551_v10 = vrot.slane %v532_v0, 4  ;;  %v554_v12 = vsel %vm321_vm1, %v553_v5, %v536_v2 }
 0x150   : > { %v428_v3 = vsel %vm321_vm1, %v427_v61, %v410_v58  ;;  %v423_v4 = vrot.slane %v418_v63, 4  ;;  %v550_v14 = vsel %vm321_vm1, %v549_v8, %v532_v0  ;;  %v555_v17 = vrot.slane %v536_v2, 4 }
 0x151   : > { %1078 = vmatpush.xpose.msk.msra.mxu3 %vm557_vm2, %v428_v3  ;;  %774 = vmatpush.msrb.mxu0 %v428_v3  ;;  %v425_v7 = vrot.slane %v406_v1, 4  ;;  %v430_v13 = vsel %vm321_vm1, %v422_v55, %v429_v6  ;;  %v552_v16 = vsel %vm321_vm1, %v544_v60, %v551_v10 }
 0x152   : > { %v424_v9 = vsel %vm321_vm1, %v423_v4, %v406_v1  ;;  %v556_v18 = vsel %vm321_vm1, %v548_v57, %v555_v17 }
 0x153   : > { %1074 = vmatpush.xpose.msk.msra.mxu1 %vm557_vm2, %v424_v9  ;;  %v426_v11 = vsel %vm321_vm1, %v418_v63, %v425_v7 }
 0x154   : > { %1076 = vmatpush.xpose.msk.msra.mxu2 %vm557_vm2, %v426_v11  ;;  %1079 = vmatmul.msk.f32.vlgmr.msra.gmra.mxu3 %vm557_vm2, %v554_v12 }
 0x155   : > { %751 = vmatpush.msrb.mxu3 %v426_v11 }
 0x156   : > { %1075 = vmatmul.msk.f32.vlgmr.msra.gmra.mxu1 %vm557_vm2, %v550_v14 }
 0x157   : > { %1080 = vmatpush.xpose.msk.msrb.mxu1 %vm557_vm2, %v430_v13  ;;  %1077 = vmatmul.msk.f32.vlgmr.msra.gmra.mxu2 %vm557_vm2, %v552_v16 }
 0x158   : > { %728 = vmatpush.msrb.mxu2 %v424_v9 }
 0x15b   : > { %797 = vmatpush.msra.mxu1 %v430_v13 }
 0x15e   : > { %1081 = vmatmul.msk.f32.vlgmr.msrb.gmra.mxu1 %vm557_vm2, %v556_v18 }
 0x1d3   : > { %v581_v19 = vpop.f32.mrf.mxu1 }
 0x1d4   : > { %v662_v20 = vmul.f32 0.17677669, %v581_v19 }
 0x1d6   : > { %v666_v21 = vsel %vm557_vm2, %v662_v20, -inf }
 0x1d7   : > { %667 = vmax.xlane.f32.xlu0 %v666_v21  ;;  %v633_v22 = vpop.f32.mrf.mxu3 }
 0x1d8   : > { %v664_v23 = vmul.f32 0.17677669, %v633_v22 }
 0x1da   : > { %v607_v25 = vpop.f32.mrf.mxu2  ;;  %v672_v27 = vsel %vm557_vm2, %v664_v23, -inf }
 0x1db   : > { %v663_v26 = vmul.f32 0.17677669, %v607_v25  ;;  %673 = vmax.xlane.f32.xlu2 %v672_v27  ;;  %v659_v28 = vpop.f32.mrf.mxu1 }
 0x1dc   : > { %v665_v30 = vmul.f32 0.17677669, %v659_v28 }
 0x1dd   : > { %v669_v29 = vsel %vm557_vm2, %v663_v26, -inf }
 0x1de   : > { %670 = vmax.xlane.f32.xlu1 %v669_v29  ;;  %v675_v31 = vsel %vm557_vm2, %v665_v30, -inf }
 0x1e3   : > { %676 = vmax.xlane.f32.xlu2 %v675_v31 }
 0x24a   : > { %v668_v32 = vpop.xlane.xlu0 %667 }
 0x24b   : > { %v678_v33 = vsub.f32 %v662_v20, %v668_v32 }
 0x24d   : > { %v682_v34 = vmul.f32 1.442695, %v678_v33 }
 0x24e   : > { %v674_v35 = vpop.xlane.xlu2 %673 }
 0x24f   : > { %1170 = vpow2.f32 %v682_v34  ;;  %v680_v36 = vsub.f32 %v664_v23, %v674_v35 }
 0x251   : > { %v671_v37 = vpop.xlane.xlu1 %670  ;;  %v686_v38 = vmul.f32 1.442695, %v680_v36 }
 0x252   : > { %v679_v39 = vsub.f32 %v663_v26, %v671_v37 }
 0x253   : > { %1172 = vpow2.f32 %v686_v38 }
 0x254   : > { %v684_v40 = vmul.f32 1.442695, %v679_v39 }
 0x255   : > { %v1171_v41 = vpop.eup %1170 }
 0x256   : > { %1174 = vpow2.f32 %v684_v40  ;;  %v690_v42 = vsel %vm557_vm2, %v1171_v41, 0.0  ;;  %v677_v43 = vpop.xlane.xlu2 %676 }
 0x257   : > { %691 = vadd.xlane.f32.xlu0 %v690_v42  ;;  %v681_v44 = vsub.f32 %v665_v30, %v677_v43 }
 0x259   : > { %v1173_v45 = vpop.eup %1172  ;;  %v688_v46 = vmul.f32 1.442695, %v681_v44 }
 0x25a   : > { %v696_v47 = vsel %vm557_vm2, %v1173_v45, 0.0 }
 0x25b   : > { %1176 = vpow2.f32 %v688_v46  ;;  %697 = vadd.xlane.f32.xlu2 %v696_v47 }
 0x25c   : > { %v1175_v48 = vpop.eup %1174 }
 0x25d   : > { %v693_v49 = vsel %vm557_vm2, %v1175_v48, 0.0 }
 0x25e   : > { %694 = vadd.xlane.f32.xlu1 %v693_v49 }
 0x261   : > { %v1177_v50 = vpop.eup %1176 }
 0x262   : > { %v699_v51 = vsel %vm557_vm2, %v1177_v50, 0.0 }
 0x263   : > { %700 = vadd.xlane.f32.xlu0 %v699_v51 }
 0x2ca   : > { %v692_v52 = vpop.xlane.xlu0 %691 }
 0x2cb   : > { %1178 = vrcp.f32 %v692_v52 }
 0x2ce   : > { %v698_v53 = vpop.xlane.xlu2 %697 }
 0x2cf   : > { %1180 = vrcp.f32 %v698_v53 }
 0x2d1   : > { %v1179_v54 = vpop.eup %1178  ;;  %v695_v55 = vpop.xlane.xlu1 %694 }
 0x2d2   : > { %1182 = vrcp.f32 %v695_v55  ;;  %v706_v56 = vmul.f32 %v1179_v54, %v1171_v41 }
 0x2d4   : > { %1082 = vmatmul.msk.f32.vlgmr.msrb.gmra.mxu2 %vm557_vm2, %v706_v56 }
 0x2d5   : > { %v1181_v57 = vpop.eup %1180 }
 0x2d6   : > { %v701_v58 = vpop.xlane.xlu0 %700  ;;  %v708_v59 = vmul.f32 %v1181_v57, %v1173_v45 }
 0x2d7   : > { %1184 = vrcp.f32 %v701_v58 }
 0x2d8   : > { %v1183_v60 = vpop.eup %1182  ;;  %1084 = vmatmul.msk.f32.vlgmr.msrb.gmra.mxu0 %vm557_vm2, %v708_v59 }
 0x2d9   : > { %v707_v61 = vmul.f32 %v1183_v60, %v1175_v48 }
 0x2db   : > { %1083 = vmatmul.msk.f32.vlgmr.msrb.gmra.mxu3 %vm557_vm2, %v707_v61 }
 0x2dd   : > { %v1185_v62 = vpop.eup %1184 }
 0x2de   : > { %v709_v63 = vmul.f32 %v1185_v62, %v1177_v50 }
 0x2e0   : > { %1085 = vmatmul.msk.f32.vlgmr.msra.gmra.mxu1 %vm557_vm2, %v709_v63 }
 0x355   : > { %v776_v0 = vpop.f32.mrf.mxu0 }
 0x356   : > { %v802_v1 = vrot.slane %v776_v0, 4 }
 0x357   : > { %v730_v2 = vpop.f32.mrf.mxu2 }
 0x358   : > { %v804_v3 = vrot.slane %v730_v2, 4  ;;  %v803_v4 = vsel %vm321_vm1, %v802_v1, %v730_v2 }
 0x359   : > { %v809_v6 = vperm.slane %v803_v4, %v1509_v15  ;;  %v433_v4 = vld [vmem:[#allocation8 + $0x10] sm:$0xff] }
 0x35a   : > { %v805_v5 = vsel %vm321_vm1, %v776_v0, %v804_v3  ;;  %v434_v3 = vld [vmem:[#allocation8 + $0x18] sm:$0xff] }
 0x35b   : > { %v813_v7 = vperm.slane %v805_v5, %v1509_v15  ;;  %v828_v14 = vrot.slane %v809_v6, 4  ;;  %947 = vmatpush.msra.mxu2 %v434_v3  ;;  %v431_v5 = vld [vmem:[#allocation8] sm:$0xff] }
 0x35d   : > { %v799_v9 = vpop.f32.mrf.mxu1  ;;  %v840_v16 = vrot.slane %v813_v7, 4  ;;  %948 = vmatpush.msra.mxu2 %v433_v4 }
 0x35e   : > { %v753_v8 = vpop.f32.mrf.mxu3  ;;  %v814_v11 = vrot.slane %v799_v9, 4 }
 0x35f   : > { %v816_v10 = vrot.slane %v753_v8, 4 }
 0x360   : > { %v815_v12 = vsel %vm321_vm1, %v814_v11, %v753_v8 }
 0x361   : > { %v817_v13 = vsel %vm321_vm1, %v799_v9, %v816_v10  ;;  %v821_v17 = vperm.slane %v815_v12, %v1509_v15  ;;  %v1169_v12 = vld [vmem:[%s1698_s4] ss:$0 sm:$0xff] }
 0x362   : > { %v825_v18 = vperm.slane %v817_v13, %v1509_v15 }
 0x363   : > { %v826_v19 = vrot.slane %v821_v17, 4  ;;  %v829_v20 = vsel %vm321_vm1, %v821_v17, %v828_v14 }
 0x364   : > { %v838_v21 = vrot.slane %v825_v18, 4  ;;  %v841_v22 = vsel %vm321_vm1, %v825_v18, %v840_v16  ;;  %v837_v23 = vperm.slane %v829_v20, %v1515_v24 }
 0x365   : > { %v849_v25 = vperm.slane %v841_v22, %v1515_v24  ;;  %v827_v26 = vsel %vm321_vm1, %v826_v19, %v809_v6 }
 0x366   : > { %v839_v27 = vsel %vm321_vm1, %v838_v21, %v813_v7  ;;  %v833_v28 = vperm.slane %v827_v26, %v1515_v24  ;;  %v852_v30 = vrot.slane %v837_v23, 4 }
 0x367   : > { %v845_v29 = vperm.slane %v839_v27, %v1515_v24  ;;  %v856_v31 = vrot.slane %v849_v25, 4 }
 0x368   : > { %v850_v32 = vrot.slane %v833_v28, 4  ;;  %v853_v33 = vsel %vm321_vm1, 0.0, %v852_v30  ;;  %v858_v36 = vsel %vm321_vm1, %v852_v30, %v833_v28 }
 0x369   : > { %v854_v34 = vrot.slane %v845_v29, 4  ;;  %v857_v35 = vsel %vm321_vm1, 0.0, %v856_v31  ;;  %v863_v37 = vrot.slane %v853_v33, 4  ;;  %v869_v38 = vsel %vm321_vm1, %v856_v31, %v845_v29 }
 0x36a   : > { %v874_v39 = vrot.slane %v857_v35, 4  ;;  %v851_v41 = vsel %vm321_vm1, 0.0, %v850_v32  ;;  %v862_v42 = vperm.slane %v858_v36, %v1509_v15  ;;  %v873_v43 = vperm.slane %v869_v38, %v1509_v15 }
 0x36b   : > { %v855_v40 = vsel %vm321_vm1, 0.0, %v854_v34  ;;  %v864_v44 = vsel %vm321_vm1, %v863_v37, %v851_v41 }
 0x36c   : > { %v875_v45 = vsel %vm321_vm1, %v874_v39, %v855_v40  ;;  %v868_v46 = vperm.slane %v864_v44, %v1509_v15  ;;  %v882_v48 = vrot.slane %v862_v42, 4  ;;  %v894_v49 = vrot.slane %v873_v43, 4 }
 0x36d   : > { %v879_v47 = vperm.slane %v875_v45, %v1509_v15 }
 0x36e   : > { %v883_v50 = vsel %vm321_vm1, %v868_v46, %v882_v48  ;;  %v880_v52 = vrot.slane %v868_v46, 4 }
 0x36f   : > { %v895_v51 = vsel %vm321_vm1, %v879_v47, %v894_v49  ;;  %v892_v53 = vrot.slane %v879_v47, 4  ;;  %v891_v54 = vperm.slane %v883_v50, %v1515_v24 }
 0x370   : > { %v903_v55 = vperm.slane %v895_v51, %v1515_v24  ;;  %v881_v56 = vsel %vm321_vm1, %v880_v52, %v862_v42 }
 0x371   : > { %v893_v57 = vsel %vm321_vm1, %v892_v53, %v873_v43  ;;  %v910_v58 = vrot.slane %v891_v54, 4  ;;  %v887_v15 = vperm.slane %v881_v56, %v1515_v24 }
 0x372   : > { %v908_v59 = vrot.slane %v903_v55, 4  ;;  %v899_v60 = vperm.slane %v893_v57, %v1515_v24  ;;  %v432_v24 = vld [vmem:[#allocation8 + $0x8] sm:$0xff] }
 0x373   : > { %v911_v61 = vsel %vm321_vm1, %v903_v55, %v910_v58  ;;  %v906_v0 = vrot.slane %v887_v15, 4  ;;  %949 = vmatpush.msra.mxu2 %v432_v24 }
 0x374   : > { %v909_v62 = vsel %vm321_vm1, %v908_v59, %v891_v54  ;;  %v904_v63 = vrot.slane %v899_v60, 4  ;;  %921 = vrot.lane.b32.xlu0 %v911_v61, %s1357_s11 }
 0x375   : > { %917 = vrot.lane.b32.xlu2 %v909_v62, %s1358_s14  ;;  %v907_v1 = vsel %vm321_vm1, %v899_v60, %v906_v0  ;;  %950 = vmatpush.msra.mxu2 %v431_v5 }
 0x376   : > { %v905_v2 = vsel %vm321_vm1, %v904_v63, %v887_v15  ;;  %913 = vrot.lane.b32.xlu1 %v907_v1, %s1359_s27 }
 0x3cf   : > { %v918_v7 = vpop.permute.xlu2 %917 }
 0x3e6   : > { %v922_v9 = vpop.permute.xlu0 %921 }
 0x3e8   : > { %v914_v6 = vpop.permute.xlu1 %913 }
 0x3e9   : > { %v924_v8 = vsel %vm557_vm2, %v905_v2, %v914_v6 }
 0x3ea   : > { %v926_v10 = vsel %vm925_vm3, %v924_v8, %v918_v7 }
 0x3eb   : > { %v928_v11 = vsel %vm927_vm4, %v926_v10, %v922_v9 }
 0x3ec   : > { %1086 = vmatmul.msk.f32.vlgmr.msra.gmra.mxu2 %vm284_vm0, %v928_v11 }
 0x46f   : > { %v952_v13 = vpop.f32.mrf.mxu2 }
 0x470   : > { %v953_v14 = vadd.f32 %v1169_v12, %v952_v13 }
 0x472   : > { %955 = vst.msk [vmem:[%s274_s26] sm:$0xff] %vm284_vm0, %v953_v14 }
 0x473   : > { %1303 = shalt.err (!%p1300_p9)
}
 0x474   : > { %1101 = dma.vmem_to_hbm [thread:$0]  (%p1459_p4), %s970_s17, 128, %s972_s8, %s957_s25  }
 0x475 PF: > { %s983_s22 = sand.u32 1, %s1334_s18   ;;  %p1706_p10 = scmp.ge.s32.totalorder %s1346_s21, 2 }
 0x476   : > { %s984_s29 = scalar_lea.sflag [#allocation5], %s983_s22 }
 0x477   : > { %p1115_p13 = pnand %p1706_p10, %p1463_p6 }
 0x479   : > { %p1116_p11 = pneg %p1115_p13 }
 0x47b   : > { %1329 = dma.done.wait (%p1116_p11), %s984_s29, 128  }
 0x47c   : > { %1331 = vsyncadd (%p1116_p11), %s984_s29, 4294967168  ;;  %p19_p0 = scmp.ge.s32.totalorder %s1433_s12, 4   ;;  %s1707_s18 = smov %s1338_s19 }
 0x47d   : > { %s1708_s19 = smov %s1342_s20  ;;  %s1709_s20 = smov %s1444_s15 }
 0x47e   : > { %s1710_s21 = smov %s1433_s12  ;;  %21 = sbr.rel (!%p19_p0) target bundleno = 6 (0x6), region = 93 }
 0x483   :  { %990 = vsyncpa [#allocation4], 1 }
 0x484   :  { %992 = vsyncpa [#allocation4 + $0x1], 1 }
 0x485   :  { %993 = vsyncpa [#allocation7], 1 }
 0x486   :  { %994 = vsyncpa [#allocation5], 1 }
 0x487   :  { %996 = vsyncpa [#allocation5 + $0x1], 1 }

</bundles_post_ra>
